<compile_context>
chip_gen: v7x
topology: tpu7x:2x2x1
jax: 0.10.0
libtpu: 0.0.40
codegen_flags: <defaults>
</compile_context>

<pallas_src>
import functools

import jax
import jax.numpy as jnp
import numpy as np
from jax import lax
from jax.experimental import pallas as pl
from jax.experimental.pallas import tpu as pltpu


def _round_up(x, m):
    return (x + m - 1) // m * m


# ---------------------------------------------------------------------------
# Kernel
# ---------------------------------------------------------------------------
def _wrapped_block_kernel(x_ref, w_ref, ctrl_ref, mask_ref, o_ref, acc_ref, *,
                          operator: str, normalize: bool, matmul_dtype):
    """One (row-tile, k-tile) grid step.

    grid = (rows // tm, H // tk). The k axis is a reduction over the block's
    contraction dim with an f32 VMEM accumulator; the activation-control
    epilogue runs once, at the last k step, on the full (tm, H) row slab.
    """
    k = pl.program_id(1)

    @pl.when(k == 0)
    def _init():
        acc_ref[...] = jnp.zeros_like(acc_ref)

    # Wrapped "block" forward (synthetic stand-in: dense projection).
    # Narrow MXU feed, f32 accumulation.
    acc_ref[...] += jnp.dot(x_ref[...].astype(matmul_dtype), w_ref[...],
                            preferred_element_type=jnp.float32)

    @pl.when(k == pl.num_programs(1) - 1)
    def _epilogue():
        modified = acc_ref[...]                          # (tm, H) f32
        ctrl = ctrl_ref[...].astype(jnp.float32)         # (1, H)
        mask = mask_ref[...].astype(jnp.float32)         # (tm, 1)
        cm = ctrl * mask                                 # controller * mask

        if normalize:
            # Only pay for norm_pre when it is actually used (static bool).
            norm_pre_sq = jnp.sum(modified * modified, axis=-1, keepdims=True)

        if operator == "linear_comb":
            modified = modified + cm
        elif operator == "piecewise_linear":
            sign = jnp.sign(jnp.sum(modified * cm, axis=-1, keepdims=True))
            modified = modified + cm * sign
        else:
            # TODO(synk): 'projection' operator is NotImplemented in the
            # reference module too.
            raise NotImplementedError(f"Operator {operator} not implemented.")

        if normalize:
            sumsq_post = jnp.sum(modified * modified, axis=-1, keepdims=True)
            # One per-row sqrt + rsqrt (EUP slots) + a single (tm, H) multiply
            # instead of an elementwise divide. Tiny eps guards zero rows.
            ratio = jnp.sqrt(norm_pre_sq) * lax.rsqrt(sumsq_post + 1e-12)
            modified = modified * ratio

        o_ref[...] = modified.astype(o_ref.dtype)


# ---------------------------------------------------------------------------
# Host-side glue
# ---------------------------------------------------------------------------
def prepare_block_weight(w, matmul_dtype=jnp.bfloat16):
    """Pre-cast the block weight ONCE (hoisted out of the per-forward path:
    a per-call cast is a full extra HBM read+write of the weight)."""
    return jnp.asarray(w, matmul_dtype)


def _token_pos_to_mask(token_pos, controller_len, B, S, dtype):
    """Convert the PyTorch token_pos branching into a (B, S, 1) mask.

    Adding `controller * mask * sign` with mask==0 outside the selected tokens
    is equivalent to the slice-assignment in the PyTorch code for both
    supported operators (per-token ops, zero injection elsewhere)."""
    col = jnp.arange(S)
    if token_pos is None:
        sel = jnp.ones((S,), dtype=bool)
    elif isinstance(token_pos, int):
        sel = col == (token_pos % S)
    elif isinstance(token_pos, (list, tuple, np.ndarray)):
        idx = jnp.asarray(np.asarray(token_pos) % S)
        sel = jnp.isin(col, idx)
    elif isinstance(token_pos, str):
        if token_pos == "end":
            sel = col >= (S - controller_len)
        elif token_pos == "start":
            sel = col < controller_len
        else:
            raise AssertionError(f"Unknown token position {token_pos}.")
    else:
        raise AssertionError(f"Unknown token position {token_pos}.")
    return jnp.broadcast_to(sel.astype(dtype)[None, :, None], (B, S, 1))


def _vmem_ceiling_bytes():
    # Generation-aware ceiling: ~75% of physical VMEM (v7x 64 MiB -> ~48 MiB,
    # v5e/v6e 128 MiB -> ~96 MiB). Conservative fallback if the query fails.
    try:
        cap = int(pltpu.get_tpu_info().vmem_capacity_bytes)
    except Exception:
        cap = 64 * 1024 * 1024
    return max(32 * 1024 * 1024, (cap * 3) // 4)


def _choose_tiles(n_rows, H, x_itemsize, out_itemsize, w_itemsize, vmem_ceiling):
    """Pick (row_tile tm, contraction_tile tk, vmem_needed)."""
    # --- contraction (weight) tiling ---------------------------------------
    # Keep the full (H, H) weight resident when it fits comfortably; otherwise
    # tile K in the largest multiple of 128 that divides H and whose
    # double-buffered (tk, H) slab fits a third of the budget.
    n128 = H // 128
    candidates = sorted({128 * m for m in range(1, n128 + 1) if n128 % m == 0},
                        reverse=True)
    tk = H
    if 2 * H * H * w_itemsize > vmem_ceiling // 3:
        tk = candidates[-1]
        for c in candidates:
            if 2 * c * H * w_itemsize <= vmem_ceiling // 3:
                tk = c
                break

    # --- row tiling ---------------------------------------------------------
    # Target ~2 MiB of activations per stream per grid step (amortizes the
    # ~0.35 us per-step overhead; measured 29% -> 85% of HBM roofline going
    # from small to multi-MiB tiles), clamped to [256, 2048] and to the total
    # (padded) row count.
    target_bytes = 2 * 1024 * 1024
    tm = target_bytes // max(1, H * max(x_itemsize, out_itemsize))
    tm = max(256, min(2048, int(tm)))
    tm = _round_up(tm, 8)
    tm = max(8, min(tm, _round_up(n_rows, 8)))

    def vmem_needed(tm_, tk_):
        return (2 * tk_ * H * w_itemsize          # weight slab (double-buffered)
                + 2 * tm_ * tk_ * x_itemsize      # x tiles
                + 2 * tm_ * H * out_itemsize      # out tiles
                + tm_ * H * 4                     # f32 accumulator scratch
                + 3 * tm_ * H * 4                 # f32 epilogue temps
                + 2 * H * 4                       # controller
                + 2 * tm_ * 4                     # mask tiles
                + 2 * 1024 * 1024)                # Mosaic internal headroom

    while tm > 8 and vmem_needed(tm, tk) > vmem_ceiling:
        tm = max(8, _round_up(tm // 2, 8))

    return tm, tk, vmem_needed(tm, tk)


def wrapped_block_forward(x, w, controller, *, mask=None, token_pos=None,
                          operator="linear_comb", normalize=False,
                          matmul_dtype=jnp.bfloat16):
    """x: (B, S, H) (f32 or bf16; output keeps x's dtype); w: (H, H)
    (ideally pre-cast via prepare_block_weight); controller: (H,)-broadcastable."""
    if operator not in ("linear_comb", "piecewise_linear"):
        # 'projection' is NotImplemented in the reference module too.
        raise NotImplementedError(f"Operator {operator} not implemented.")

    B, S, H = x.shape
    if H % 128 != 0:
        raise ValueError("hidden dim must be a multiple of 128 (pad upstream) "
                         "for lane-dense loads/stores")

    # Weight should arrive pre-cast; fall back to a cast here if not.
    w_mm = w if w.dtype == jnp.dtype(matmul_dtype) else jnp.asarray(w, matmul_dtype)
    controller = jnp.reshape(jnp.squeeze(jnp.asarray(controller)),
                             (1, H)).astype(jnp.float32)

    # (B, S, 1) injection mask (cheap host-side glue), then flatten rows.
    # TODO(synk): the `position_ids`-derived mask branch of the PyTorch module
    # is not reproduced; pass `mask=` explicitly instead.
    if mask is None:
        base_mask = jnp.ones((B, S, 1), jnp.float32)
    else:
        base_mask = jnp.broadcast_to(
            jnp.asarray(mask, jnp.float32).reshape(B, S, 1), (B, S, 1))
    pos_mask = _token_pos_to_mask(token_pos, 1, B, S, jnp.float32)
    full_mask = (base_mask * pos_mask).reshape(B * S, 1)

    # Flatten (B, S) -> rows.
    n_rows = B * S
    x2 = x.reshape(n_rows, H)

    x_itemsize = jnp.dtype(x.dtype).itemsize
    out_itemsize = x_itemsize
    w_itemsize = jnp.dtype(matmul_dtype).itemsize
    vmem_ceiling = _vmem_ceiling_bytes()
    tm, tk, vmem_needed = _choose_tiles(n_rows, H, x_itemsize, out_itemsize,
                                        w_itemsize, vmem_ceiling)

    rows_pad = _round_up(n_rows, tm)
    if rows_pad != n_rows:
        x2 = jnp.pad(x2, ((0, rows_pad - n_rows), (0, 0)))
        full_mask = jnp.pad(full_mask, ((0, rows_pad - n_rows), (0, 0)))

    n_row_tiles = rows_pad // tm
    n_k_tiles = H // tk

    kernel = functools.partial(_wrapped_block_kernel, operator=operator,
                               normalize=normalize, matmul_dtype=matmul_dtype)

    # Scheduling hint for XLA around the custom call.
    flops = 2 * rows_pad * H * H + 6 * rows_pad * H
    bytes_accessed = (rows_pad * H * (x_itemsize + out_itemsize)
                      + (n_row_tiles if n_k_tiles > 1 else 1) * H * H * w_itemsize
                      + H * 4 + rows_pad * 4)
    cost = pl.CostEstimate(flops=int(flops),
                           transcendentals=int(2 * rows_pad) if normalize else 0,
                           bytes_accessed=int(bytes_accessed))

    vmem_limit = int(min(vmem_ceiling, max(32 * 1024 * 1024, vmem_needed)))

    out = pl.pallas_call(
        kernel,
        out_shape=jax.ShapeDtypeStruct((rows_pad, H), x.dtype),
        grid_spec=pltpu.PrefetchScalarGridSpec(
            num_scalar_prefetch=0,
            grid=(n_row_tiles, n_k_tiles),
            in_specs=[
                pl.BlockSpec((tm, tk), lambda i, k: (i, k)),   # x row tile
                pl.BlockSpec((tk, H), lambda i, k: (k, 0)),    # weight K slab
                pl.BlockSpec((1, H), lambda i, k: (0, 0)),     # controller (invariant)
                pl.BlockSpec((tm, 1), lambda i, k: (i, 0)),    # injection mask
            ],
            out_specs=pl.BlockSpec((tm, H), lambda i, k: (i, 0)),
            scratch_shapes=[pltpu.VMEM((tm, H), jnp.float32)],  # f32 accumulator
        ),
        compiler_params=pltpu.CompilerParams(
            dimension_semantics=("parallel", "arbitrary"),
            vmem_limit_bytes=vmem_limit),
        cost_estimate=cost,
    )(x2, w_mm, controller, full_mask)

    out = out[:n_rows] if rows_pad != n_rows else out
    return out.reshape(B, S, H)


# ---------------------------------------------------------------------------
# Pure-JAX reference (same bf16-feed / f32-accumulate precision choice)
# ---------------------------------------------------------------------------
def _reference(x, w, controller, mask, operator, normalize,
               matmul_dtype=jnp.bfloat16):
    modified = jnp.einsum("bsh,hd->bsd",
                          x.astype(matmul_dtype), w.astype(matmul_dtype),
                          preferred_element_type=jnp.float32)
    norm_pre = jnp.linalg.norm(modified, axis=-1, keepdims=True)
    cm = controller.reshape(1, 1, -1).astype(jnp.float32) * mask
    if operator == "linear_comb":
        out = modified + cm
    else:
        sign = jnp.sign(jnp.sum(modified * cm, axis=-1, keepdims=True))
        out = modified + cm * sign
    if normalize:
        norm_post = jnp.linalg.norm(out, axis=-1, keepdims=True)
        out = out / norm_post * norm_pre
    return out.astype(x.dtype)


if __name__ == "__main__":
    B, S, H = 2, 16, 128          # small but lane-dense (H multiple of 128)
    key = jax.random.PRNGKey(0)
    kx, kw, kc = jax.random.split(key, 3)

    x = jax.random.normal(kx, (B, S, H), dtype=jnp.float32)
    w = jax.random.normal(kw, (H, H), dtype=jnp.float32) * (1.0 / np.sqrt(H))
    controller = jax.random.normal(kc, (H,), dtype=jnp.float32)

    w_mm = prepare_block_weight(w)   # cast once, outside the per-call path

    # Case 1: linear_comb on all tokens, no normalization.
    out1 = wrapped_block_forward(x, w_mm, controller,
                                 operator="linear_comb", normalize=False)
    jax.block_until_ready(out1)
    ref1 = _reference(x, w, controller, jnp.ones((B, S, 1), jnp.float32),
                      "linear_comb", False)
    assert jnp.allclose(out1, ref1, atol=2e-3, rtol=2e-3), "case 1 mismatch"

    # Case 2: piecewise_linear on the last token ('end'), with normalization.
    out2 = wrapped_block_forward(x, w_mm, controller, token_pos="end",
                                 operator="piecewise_linear", normalize=True)
    jax.block_until_ready(out2)
    end_mask = jnp.broadcast_to(
        (jnp.arange(S) >= S - 1).astype(jnp.float32)[None, :, None], (B, S, 1))
    ref2 = _reference(x, w, controller, end_mask, "piecewise_linear", True)
    assert jnp.allclose(out2, ref2, atol=2e-3, rtol=2e-3), "case 2 mismatch"

    # Case 3: bf16 activations end-to-end (halves HBM traffic in the
    # bandwidth-bound regime); loose tolerance for bf16 output rounding.
    xb = x.astype(jnp.bfloat16)
    out3 = wrapped_block_forward(xb, w_mm, controller,
                                 operator="linear_comb", normalize=False)
    jax.block_until_ready(out3)
    ref3 = _reference(xb, w, controller, jnp.ones((B, S, 1), jnp.float32),
                      "linear_comb", False)
    assert jnp.allclose(out3.astype(jnp.float32), ref3.astype(jnp.float32),
                        atol=1e-1, rtol=1e-1), "case 3 mismatch"

    print("KERNEL_OK")
</pallas_src>

<mosaic_0001>
module attributes {stable_mosaic.version = 11 : i64} {
  func.func @_wrapped_block_kernel(%arg0: i32, %arg1: i32, %arg2: memref<32x128xf32, #tpu.memory_space<vmem>>, %arg3: memref<128x128xbf16, #tpu.memory_space<vmem>>, %arg4: memref<1x128xf32, #tpu.memory_space<vmem>>, %arg5: memref<32x1xf32, #tpu.memory_space<vmem>>, %arg6: memref<32x128xf32, #tpu.memory_space<vmem>>, %arg7: memref<32x128xf32, #tpu.memory_space<vmem>>) attributes {dimension_semantics = [#tpu.dimension_semantics<parallel>, #tpu.dimension_semantics<arbitrary>], iteration_bounds = array<i64: 1, 1>, scalar_prefetch = 0 : i64, scratch_operands = 1 : i64, tpu.core_type = #tpu.core_type<tc>, window_params = [{transform_indices = @transform_0, window_bounds = array<i64: 32, 128>}, {transform_indices = @transform_1, window_bounds = array<i64: 128, 128>}, {pipeline_mode = #tpu.pipeline_mode<synchronous>, transform_indices = @transform_2, window_bounds = array<i64: 1, 128>}, {transform_indices = @transform_3, window_bounds = array<i64: 32, 1>}, {transform_indices = @transform_4, window_bounds = array<i64: 32, 128>}]} {
    %c0_i32 = arith.constant 0 : i32
    %0 = arith.cmpi eq, %arg1, %c0_i32 : i32
    %1 = arith.extui %0 : i1 to i32
    %c0_i32_0 = arith.constant 0 : i32
    %2 = arith.cmpi ne, %1, %c0_i32_0 : i32
    scf.if %2 {
      %cst_10 = arith.constant 0.000000e+00 : f32
      %13 = vector.broadcast %cst_10 : f32 to vector<32x128xf32>
      %c0_11 = arith.constant 0 : index
      %c0_12 = arith.constant 0 : index
      %14 = vector.load %arg7[%c0_11, %c0_12] : memref<32x128xf32, #tpu.memory_space<vmem>>, vector<32x128xf32>
      tpu.vector_store %arg7[%c0_11, %c0_12], %13 {strides = array<i32>} : memref<32x128xf32, #tpu.memory_space<vmem>>, vector<32x128xf32>,
    } else {
    }
    %c0 = arith.constant 0 : index
    %c0_1 = arith.constant 0 : index
    %3 = vector.load %arg7[%c0, %c0_1] : memref<32x128xf32, #tpu.memory_space<vmem>>, vector<32x128xf32>
    %c0_2 = arith.constant 0 : index
    %c0_3 = arith.constant 0 : index
    %4 = vector.load %arg2[%c0_2, %c0_3] : memref<32x128xf32, #tpu.memory_space<vmem>>, vector<32x128xf32>
    %5 = arith.truncf %4 : vector<32x128xf32> to vector<32x128xbf16>
    %c0_4 = arith.constant 0 : index
    %c0_5 = arith.constant 0 : index
    %6 = vector.load %arg3[%c0_4, %c0_5] : memref<128x128xbf16, #tpu.memory_space<vmem>>, vector<128x128xbf16>
    %cst = arith.constant dense<0.000000e+00> : vector<32x128xf32>
    %7 = tpu.matmul %5, %6, %cst {dimension_numbers = #tpu.dot_dimension_numbers<[1], [0], [0], [1], [0, 0, 1, 1], [], []>} : vector<32x128xbf16>, vector<128x128xbf16>, vector<32x128xf32> -> vector<32x128xf32>
    %8 = arith.addf %3, %7 : vector<32x128xf32>
    %c0_6 = arith.constant 0 : index
    %c0_7 = arith.constant 0 : index
    %9 = vector.load %arg7[%c0_6, %c0_7] : memref<32x128xf32, #tpu.memory_space<vmem>>, vector<32x128xf32>
    tpu.vector_store %arg7[%c0_6, %c0_7], %8 {strides = array<i32>} : memref<32x128xf32, #tpu.memory_space<vmem>>, vector<32x128xf32>,
    %c0_i32_8 = arith.constant 0 : i32
    %10 = arith.cmpi eq, %arg1, %c0_i32_8 : i32
    %11 = arith.extui %10 : i1 to i32
    %c0_i32_9 = arith.constant 0 : i32
    %12 = arith.cmpi ne, %11, %c0_i32_9 : i32
    scf.if %12 {
      %c0_10 = arith.constant 0 : index
      %c0_11 = arith.constant 0 : index
      %13 = vector.load %arg7[%c0_10, %c0_11] : memref<32x128xf32, #tpu.memory_space<vmem>>, vector<32x128xf32>
      %c0_12 = arith.constant 0 : index
      %c0_13 = arith.constant 0 : index
      %14 = vector.load %arg4[%c0_12, %c0_13] : memref<1x128xf32, #tpu.memory_space<vmem>>, vector<1x128xf32>
      %c0_14 = arith.constant 0 : index
      %c0_15 = arith.constant 0 : index
      %15 = vector.load %arg5[%c0_14, %c0_15] : memref<32x1xf32, #tpu.memory_space<vmem>>, vector<32x1xf32>
      %16 = vector.broadcast %14 : vector<1x128xf32> to vector<32x128xf32>
      %17 = vector.broadcast %15 : vector<32x1xf32> to vector<32x128xf32>
      %18 = arith.mulf %16, %17 : vector<32x128xf32>
      %19 = arith.addf %13, %18 : vector<32x128xf32>
      %c0_16 = arith.constant 0 : index
      %c0_17 = arith.constant 0 : index
      %20 = vector.load %arg6[%c0_16, %c0_17] : memref<32x128xf32, #tpu.memory_space<vmem>>, vector<32x128xf32>
      tpu.vector_store %arg6[%c0_16, %c0_17], %19 {strides = array<i32>} : memref<32x128xf32, #tpu.memory_space<vmem>>, vector<32x128xf32>,
    } else {
    }
    return
  }
  func.func @transform_0(%arg0: i32, %arg1: i32) -> (i32, i32) {
    %c0_i32 = arith.constant 0 : i32
    return %arg0, %arg1 : i32, i32
  }
  func.func @transform_1(%arg0: i32, %arg1: i32) -> (i32, i32) {
    %c0_i32 = arith.constant 0 : i32
    %c0_i32_0 = arith.constant 0 : i32
    return %arg1, %c0_i32 : i32, i32
  }
  func.func @transform_2(%arg0: i32, %arg1: i32) -> (i32, i32) {
    %c0_i32 = arith.constant 0 : i32
    %c0_i32_0 = arith.constant 0 : i32
    %c0_i32_1 = arith.constant 0 : i32
    return %c0_i32, %c0_i32_0 : i32, i32
  }
  func.func @transform_3(%arg0: i32, %arg1: i32) -> (i32, i32) {
    %c0_i32 = arith.constant 0 : i32
    %c0_i32_0 = arith.constant 0 : i32
    return %arg0, %c0_i32 : i32, i32
  }
  func.func @transform_4(%arg0: i32, %arg1: i32) -> (i32, i32) {
    %c0_i32 = arith.constant 0 : i32
    %c0_i32_0 = arith.constant 0 : i32
    return %arg0, %c0_i32 : i32, i32
  }
}

</mosaic_0001>

<bundles_post_ra>
// kernel: tpu_custom_call.1
= control target key start
LH: loop header
LB: loop body
LE: loop exit
PB: predicated region body
PF: predicated region fallthrough
CT: control target
= control target key end

     0   :  { %9 = vsyncpa [#allocation4], 0  ;;  %s426_s0 = inlined_call_operand.vmem [shape: f32[32,128], index: 0, kind: input, shape index: {}]   ;;  %s427_s1 = inlined_call_operand.hbm [shape: bf16[128,128], index: 1, kind: input, shape index: {}]   ;;  %s428_s2 = inlined_call_operand.vmem [shape: f32[1,128], index: 2, kind: input, shape index: {}]   ;;  %s429_s3 = inlined_call_operand.vmem [shape: f32[32,1], index: 3, kind: input, shape index: {}]   ;;  %s430_s4 = inlined_call_operand.hbm [shape: f32[32,128], index: 4, kind: output, shape index: {}]  }
   0x1   :  { %10 = vsyncpa [#allocation5], 0  ;;  %s343_s15 = smov [#allocation3]   ;;  %s295_s19 = scalar_lea.hbm %s427_s1, 1024 }
   0x2   :  { %s18_s16 = sshll.u32 %s343_s15, 4  ;;  %p296_p0 = scmp.ne.s32.totalorder %s427_s1, %s295_s19  ;;  %s19_s16 = int_to_ptr.vmem [resolvable:$true] %s18_s16 }
   0x3   :  { %p299_p1 = scmp.lt.u32.totalorder %s295_s19, %s427_s1 }
   0x5   :  { %p301_p2 = pnand %p299_p1, %p296_p0 }
   0x7   :  { %304 = shalt.err (!%p301_p2)
}
   0x8   :  { %s305_s24 = scalar_lea.vmem %s19_s16, 1024  ;;  %p310_p4 = scmp.lt.s32.totalorder %s19_s16, %s19_s16 }
   0x9   :  { %p306_p3 = scmp.ne.s32.totalorder %s19_s16, %s305_s24  ;;  %p311_p5 = scmp.lt.s32.totalorder %s305_s24, %s305_s24 }
   0xb   :  { %p312_p6 = por %p311_p5, %p310_p4 }
   0xd   :  { %p313_p7 = pnand %p312_p6, %p306_p3 }
   0xf   :  { %316 = shalt.err (!%p313_p7)
}
  0x10   :  { %s344_s25 = smov 64   ;;  %s345_s26 = smov 4  }
  0x11   :  { %24 = dma.hbm_to_vmem [thread:$0]  %s427_s1, 1024, %s19_s16, [#allocation4], %s344_s25, %s344_s25, %s345_s26  }
  0x12   :  { %339 = dma.done.wait [#allocation4], 1024  }
  0x13   :  { %340 = vsyncadd [#allocation4], 4294966272  ;;  %v346_v0 = vmov 0   ;;  %v287_v1 = vld [vmem:[#allocation3] sm:$0xff]   ;;  %v288_v2 = vld [vmem:[#allocation3 + $0x8] sm:$0xff]   ;;  %s347_s19 = smov [#allocation6]  }
  0x14   :  { %286 = vset.pattern.permute.xlu1 %v346_v0  ;;  %285 = vset.pattern.permute.xlu0 %v346_v0  ;;  %v289_v3 = vld [vmem:[#allocation3 + $0x10] sm:$0xff]   ;;  %v290_v4 = vld [vmem:[#allocation3 + $0x18] sm:$0xff]   ;;  %v45_v5 = vld [vmem:[%s426_s0] sm:$0xff]  ;;  %s227_s20 = sshll.u32 %s347_s19, 4  ;;  %s228_s20 = int_to_ptr.vmem [resolvable:$true] %s227_s20 }
  0x15   :  { %258 = vmatprep.subr.bf16.mxu0 %v287_v1  ;;  %v46_v6 = vld [vmem:[%s426_s0 + $0x8] sm:$0xff]  ;;  %v182_v8 = vld [vmem:[%s429_s3 + $0x10] sm:$0xff]  ;;  %v180_v9 = vld [vmem:[%s429_s3] sm:$0xff]  ;;  %p322_p9 = scmp.lt.s32.totalorder %s228_s20, %s228_s20 }
  0x16   :  { %259 = vmatpush3.bf16.msra.mxu0 %v287_v1  ;;  %v49_v7 = vpack.c.bf16 %v46_v6, %v45_v5  ;;  %202 = vperm.xlu1 %286, %v182_v8   ;;  %v183_v10 = vld [vmem:[%s429_s3 + $0x18] sm:$0xff]  ;;  %v181_v11 = vld [vmem:[%s429_s3 + $0x8] sm:$0xff]  ;;  %v291_v12 = vld [vmem:[#allocation3 + $0x20] sm:$0xff]  }
  0x17   :  { %260 = vmatprep.subr.bf16.mxu0 %v288_v2  ;;  %192 = vperm.xlu0 %285, %v180_v9   ;;  %v292_v13 = vld [vmem:[#allocation3 + $0x28] sm:$0xff]   ;;  %v293_v14 = vld [vmem:[#allocation3 + $0x30] sm:$0xff]   ;;  %v294_v15 = vld [vmem:[#allocation3 + $0x38] sm:$0xff]  }
  0x18   :  { %274 = vmatprep.mubr.bf16.mxu0 %v49_v7  ;;  %v47_v16 = vld [vmem:[%s426_s0 + $0x10] sm:$0xff]  ;;  %v48_v17 = vld [vmem:[%s426_s0 + $0x18] sm:$0xff]  ;;  %v247_v21 = vld [vmem:[%s428_s2] ss:$0 sm:$0xff]  ;;  %s317_s0 = scalar_lea.vmem %s228_s20, 512 }
  0x19   :  { %v50_v18 = vpack.c.bf16 %v48_v17, %v47_v16  ;;  %p318_p8 = scmp.ne.s32.totalorder %s228_s20, %s317_s0  ;;  %p323_p10 = scmp.lt.s32.totalorder %s317_s0, %s317_s0 }
  0x1a   :  { %261 = vmatpush3.bf16.msra.mxu0 %v288_v2  ;;  %207 = vperm.xlu1 %286, %v183_v10  }
  0x1b   :  { %262 = vmatprep.subr.bf16.mxu0 %v289_v3  ;;  %197 = vperm.xlu0 %285, %v181_v11   ;;  %p324_p11 = por %p323_p10, %p322_p9 }
  0x1d   :  { %p325_p12 = pnand %p324_p11, %p318_p8 }
  0x1e   :  { %263 = vmatpush3.bf16.msra.mxu0 %v289_v3 }
  0x1f   :  { %264 = vmatprep.subr.bf16.mxu0 %v290_v4 }
  0x22   :  { %265 = vmatpush3.bf16.msra.mxu0 %v290_v4 }
  0x23   :  { %266 = vmatprep.subr.bf16.mxu0 %v291_v12 }
  0x26   :  { %267 = vmatpush3.bf16.msra.mxu0 %v291_v12 }
  0x27   :  { %268 = vmatprep.subr.bf16.mxu0 %v292_v13 }
  0x2a   :  { %269 = vmatpush3.bf16.msra.mxu0 %v292_v13 }
  0x2b   :  { %270 = vmatprep.subr.bf16.mxu0 %v293_v14 }
  0x2e   :  { %271 = vmatpush3.bf16.msra.mxu0 %v293_v14 }
  0x2f   :  { %272 = vmatprep.subr.bf16.mxu0 %v294_v15 }
  0x32   :  { %273 = vmatpush3.bf16.msra.mxu0 %v294_v15 }
  0x35   :  { %275 = vmatmul.mubr.bf16.vlgmr.msra.gmra.mrb[0].mxu0 %v50_v18 }
  0x95   :  { %v203_v19 = vpop.permute.xlu1 %202 }
  0x96   :  { %v193_v20 = vpop.permute.xlu0 %192  ;;  %v212_v22 = vmul.f32 %v247_v21, %v203_v19 }
  0x97   :  { %v210_v25 = vmul.f32 %v247_v21, %v193_v20 }
  0x99   :  { %v208_v23 = vpop.permute.xlu1 %207 }
  0x9a   :  { %v198_v24 = vpop.permute.xlu0 %197  ;;  %v213_v27 = vmul.f32 %v247_v21, %v208_v23 }
  0x9b   :  { %v211_v30 = vmul.f32 %v247_v21, %v198_v24 }
 0x108   :  { %v276_v26 = vpop.f32.mrb[0].mxu0 }
 0x109   :  { %v216_v28 = vadd.f32 %v276_v26, %v212_v22  ;;  %v149_v29 = vpop.f32.mrb[1].mxu0 }
 0x10a   :  { %v214_v31 = vadd.f32 %v210_v25, %v149_v29  ;;  %v277_v32 = vpop.f32.mrb[2].mxu0 }
 0x10b   :  { %220 = vst [vmem:[#allocation6 + $0x10] sm:$0xff] %v216_v28  ;;  %v217_v33 = vadd.f32 %v277_v32, %v213_v27  ;;  %v152_v34 = vpop.f32.mrb[3].mxu0 }
 0x10c   :  { %218 = vst [vmem:[#allocation6] sm:$0xff] %v214_v31  ;;  %v215_v35 = vadd.f32 %v211_v30, %v152_v34 }
 0x10d   :  { %221 = vst [vmem:[#allocation6 + $0x18] sm:$0xff] %v217_v33 }
 0x10e   :  { %219 = vst [vmem:[#allocation6 + $0x8] sm:$0xff] %v215_v35 }
 0x10f   :  { %328 = shalt.err (!%p325_p12)
}
 0x110   :  { %s329_s22 = scalar_lea.hbm %s430_s4, 512 }
 0x111   :  { %p330_p13 = scmp.ne.s32.totalorder %s430_s4, %s329_s22  ;;  %p333_p0 = scmp.lt.u32.totalorder %s329_s22, %s430_s4 }
 0x113   :  { %p335_p1 = pnand %p333_p0, %p330_p13 }
 0x115   :  { %338 = shalt.err (!%p335_p1)
}
 0x116   :  { %s348_s27 = smov 128   ;;  %s349_s28 = smov 8  }
 0x117   :  { %233 = dma.vmem_to_hbm [thread:$0]  %s228_s20, 512, %s430_s4, [#allocation5], %s348_s27, %s348_s27, %s349_s28  }
 0x118   :  { %341 = dma.done.wait [#allocation5], 512  }
 0x119   :  { %342 = vsyncadd [#allocation5], 4294966784 }
 0x11a   :  { %237 = vsyncpa [#allocation4], 1 }
 0x11b   :  { %238 = vsyncpa [#allocation5], 1 }

</bundles_post_ra>
